<compile_context>
chip_gen: v5e
topology: v5e:2x2
jax: 0.10.0
libtpu: 0.0.40
codegen_flags: <defaults>
</compile_context>

<pallas_src>
import functools

import jax
import jax.numpy as jnp
from jax.experimental import pallas as pl
from jax.experimental.pallas import tpu as pltpu


_NEG_INF = -1e30  # large negative baked into padded class columns of the bias


def _round_up(x, m):
    return (x + m - 1) // m * m


def _pick_tile(dim, max_tile):
    """Largest multiple-of-128 tile <= max_tile that evenly divides dim.

    `dim` is already a multiple of 128, so this always terminates at >=128.
    """
    if dim <= max_tile:
        return dim
    t = max_tile
    while t > 128 and dim % t:
        t -= 128
    return t


def _vmem_limit_bytes():
    """Generation-aware scoped-VMEM request (v7x has only 64 MiB physical)."""
    try:
        cap = pltpu.get_tpu_info().vmem_capacity_bytes
    except Exception:  # interpret mode / older runtimes
        cap = 128 * 1024 * 1024
    # 48 MiB on a 64 MiB part (v7x), 64 MiB on 128 MiB parts (v5e/v6e).
    return min(64 * 1024 * 1024, int(0.75 * cap))


# ---------------------------------------------------------------------------
# Kernels
# ---------------------------------------------------------------------------

def proj_kernel(x_ref, w_ref, p_ref):
    """P_tile = X_tile @ W^T  (feature -> class projection, done first)."""
    p = jnp.dot(x_ref[...], w_ref[...], preferred_element_type=jnp.float32)
    p_ref[...] = p.astype(p_ref.dtype)


def prop_kernel(s_ref, p_ref, h_ref, acc_ref):
    """H1 = S @ P, K-tiled over the contraction axis with an f32 accumulator."""
    k = pl.program_id(1)

    @pl.when(k == 0)
    def _():
        acc_ref[...] = jnp.zeros_like(acc_ref)

    acc_ref[...] += jnp.dot(s_ref[...], p_ref[...],
                            preferred_element_type=jnp.float32)

    @pl.when(k == pl.num_programs(1) - 1)
    def _():
        h_ref[...] = acc_ref[...].astype(h_ref.dtype)


def prop_bias_logsoftmax_kernel(s_ref, h_ref, b_ref, o_ref, acc_ref):
    """Z = S @ H1 + b (K-tiled), then log-softmax epilogue on the last k step.

    The bias already carries -1e30 in padded class columns, so no extra
    iota/mask work is needed in the epilogue.
    """
    k = pl.program_id(1)

    @pl.when(k == 0)
    def _():
        acc_ref[...] = jnp.zeros_like(acc_ref)

    acc_ref[...] += jnp.dot(s_ref[...], h_ref[...],
                            preferred_element_type=jnp.float32)

    @pl.when(k == pl.num_programs(1) - 1)
    def _():
        z = acc_ref[...] + b_ref[...]
        m = jnp.max(z, axis=1, keepdims=True)
        e = jnp.exp(z - m)
        lse = jnp.log(jnp.sum(e, axis=1, keepdims=True)) + m
        o_ref[...] = z - lse


# ---------------------------------------------------------------------------
# Wrapper
# ---------------------------------------------------------------------------

def _compiler_params(dim_semantics, vmem_limit):
    return pltpu.CompilerParams(
        dimension_semantics=dim_semantics,
        vmem_limit_bytes=vmem_limit,
    )


@functools.partial(jax.jit, static_argnames=("tm", "tk", "vmem_limit"))
def _sgcnet_forward_impl(s, x, weight, bias, *, tm, tk, vmem_limit):
    n, f = x.shape
    c = weight.shape[0]

    np_ = _round_up(n, 128)
    fp = _round_up(f, 128)
    cp = _round_up(c, 128)

    bf16 = jnp.bfloat16

    # Zero-pad to MXU / lane friendly shapes, building operands directly in
    # bf16 (no f32 N^2 transient).  Padded rows/cols are zero so real outputs
    # are unaffected; padded class columns are masked via the bias.
    s_pad = jnp.zeros((np_, np_), bf16).at[:n, :n].set(s.astype(bf16))
    x_pad = jnp.zeros((np_, fp), bf16).at[:n, :f].set(x.astype(bf16))
    w_pad = jnp.zeros((fp, cp), bf16).at[:f, :c].set(weight.T.astype(bf16))
    b_pad = jnp.full((1, cp), _NEG_INF, jnp.float32).at[0, :c].set(bias)

    row_grid = (np_ // tm,)
    prop_grid = (np_ // tm, np_ // tk)

    # 1) Projection to class space: P = X @ W^T  (contract over F exactly once).
    p = pl.pallas_call(
        proj_kernel,
        out_shape=jax.ShapeDtypeStruct((np_, cp), bf16),
        grid_spec=pltpu.PrefetchScalarGridSpec(
            num_scalar_prefetch=0,
            grid=row_grid,
            in_specs=[
                pl.BlockSpec((tm, fp), lambda i: (i, 0)),
                pl.BlockSpec((fp, cp), lambda i: (0, 0)),  # grid-invariant
            ],
            out_specs=pl.BlockSpec((tm, cp), lambda i: (i, 0)),
        ),
        compiler_params=_compiler_params(("parallel",), vmem_limit),
    )(x_pad, w_pad)

    # 2) First propagation: H1 = S @ P   (row x k tiled, f32 accumulator).
    h1 = pl.pallas_call(
        prop_kernel,
        out_shape=jax.ShapeDtypeStruct((np_, cp), bf16),
        grid_spec=pltpu.PrefetchScalarGridSpec(
            num_scalar_prefetch=0,
            grid=prop_grid,
            in_specs=[
                pl.BlockSpec((tm, tk), lambda i, k: (i, k)),
                pl.BlockSpec((tk, cp), lambda i, k: (k, 0)),
            ],
            out_specs=pl.BlockSpec((tm, cp), lambda i, k: (i, 0)),
            scratch_shapes=[pltpu.VMEM((tm, cp), jnp.float32)],
        ),
        compiler_params=_compiler_params(("parallel", "arbitrary"), vmem_limit),
    )(s_pad, p)

    # 3) Second propagation + bias + log-softmax (lane-dense padded output).
    out_pad = pl.pallas_call(
        prop_bias_logsoftmax_kernel,
        out_shape=jax.ShapeDtypeStruct((np_, cp), jnp.float32),
        grid_spec=pltpu.PrefetchScalarGridSpec(
            num_scalar_prefetch=0,
            grid=prop_grid,
            in_specs=[
                pl.BlockSpec((tm, tk), lambda i, k: (i, k)),
                pl.BlockSpec((tk, cp), lambda i, k: (k, 0)),
                pl.BlockSpec((1, cp), lambda i, k: (0, 0)),   # grid-invariant
            ],
            out_specs=pl.BlockSpec((tm, cp), lambda i, k: (i, 0)),
            scratch_shapes=[pltpu.VMEM((tm, cp), jnp.float32)],
        ),
        compiler_params=_compiler_params(("parallel", "arbitrary"), vmem_limit),
    )(s_pad, h1, b_pad)

    return out_pad[:n, :c]


def sgcnet_forward(s, x, weight, bias):
    """SGCNet forward: log_softmax(S @ (S @ (X @ W^T)) + b).

    s:      (N, N) dense normalized adjacency (f32)
    x:      (N, F) node features (f32)
    weight: (C, F) PyTorch Linear weight
    bias:   (C,)   PyTorch Linear bias
    returns (N, C) log-probabilities (f32)
    """
    n = x.shape[0]
    np_ = _round_up(n, 128)
    # Tiles must divide np_ (padded to 128 only, per perf review); pick the
    # largest multiples of 128 that do.
    tm = _pick_tile(np_, 512)    # row tile (parallel axis)
    tk = _pick_tile(np_, 2048)   # contraction tile (arbitrary axis)
    return _sgcnet_forward_impl(
        s, x, weight, bias, tm=tm, tk=tk, vmem_limit=_vmem_limit_bytes())


# ---------------------------------------------------------------------------
# Glue (stays in plain JAX): edge_index -> dense normalized adjacency
# ---------------------------------------------------------------------------

def build_normalized_adjacency(edge_index, num_nodes):
    """Dense S = D^{-1/2} (A + I) D^{-1/2}, matching PyG gcn_norm w/ self-loops."""
    row, col = edge_index[0], edge_index[1]
    a = jnp.zeros((num_nodes, num_nodes), jnp.float32)
    a = a.at[row, col].add(1.0)                       # edge_weight = 1
    a = a + jnp.eye(num_nodes, dtype=jnp.float32)     # add self-loops
    deg = jnp.sum(a, axis=1)
    dinv = jnp.where(deg > 0, 1.0 / jnp.sqrt(deg), 0.0)
    return dinv[:, None] * a * dinv[None, :]


def reference_forward(s, x, weight, bias):
    h = s @ (s @ x)
    z = h @ weight.T + bias
    return jax.nn.log_softmax(z, axis=1)


if __name__ == "__main__":
    # Small synthetic "dataset": 16 nodes, 32 features, 8 classes, 48 edges.
    N, F, C, E = 16, 32, 8, 48

    key = jax.random.PRNGKey(0)
    k_x, k_src, k_dst, k_w, k_b = jax.random.split(key, 5)

    x = jax.random.normal(k_x, (N, F), dtype=jnp.float32)           # data.x
    src = jax.random.randint(k_src, (E,), 0, N)
    dst = jax.random.randint(k_dst, (E,), 0, N)
    edge_index = jnp.stack([src, dst], axis=0)                       # data.edge_index

    # Deterministic init for SGConv's internal Linear(F, C, bias=True).
    weight = jax.random.normal(k_w, (C, F), dtype=jnp.float32) * (1.0 / jnp.sqrt(F))
    bias = jax.random.normal(k_b, (C,), dtype=jnp.float32) * 0.01

    s = build_normalized_adjacency(edge_index, N)

    out = sgcnet_forward(s, x, weight, bias)
    out = jax.block_until_ready(out)

    ref = reference_forward(s, x, weight, bias)
    assert out.shape == (N, C)
    # bf16 MXU operands (with f32 accumulation) -> looser tolerance than pure f32.
    assert jnp.allclose(out, ref, rtol=5e-2, atol=1e-1), "mismatch vs. JAX reference"
    # Each row must be a valid log-probability distribution.
    assert jnp.allclose(jnp.sum(jnp.exp(out), axis=1), 1.0, atol=1e-3)

    print("KERNEL_OK")
</pallas_src>

<mosaic_0001>
module attributes {stable_mosaic.version = 11 : i64} {
  func.func @proj_kernel(%arg0: i32, %arg1: memref<128x128xbf16, #tpu.memory_space<vmem>>, %arg2: memref<128x128xbf16, #tpu.memory_space<vmem>>, %arg3: memref<128x128xbf16, #tpu.memory_space<vmem>>) attributes {dimension_semantics = [#tpu.dimension_semantics<parallel>], iteration_bounds = array<i64: 1>, scalar_prefetch = 0 : i64, scratch_operands = 0 : i64, tpu.core_type = #tpu.core_type<tc>, window_params = [{transform_indices = @transform_0, window_bounds = array<i64: 128, 128>}, {pipeline_mode = #tpu.pipeline_mode<synchronous>, transform_indices = @transform_1, window_bounds = array<i64: 128, 128>}, {transform_indices = @transform_2, window_bounds = array<i64: 128, 128>}]} {
    %c0 = arith.constant 0 : index
    %c0_0 = arith.constant 0 : index
    %0 = vector.load %arg1[%c0, %c0_0] : memref<128x128xbf16, #tpu.memory_space<vmem>>, vector<128x128xbf16>
    %c0_1 = arith.constant 0 : index
    %c0_2 = arith.constant 0 : index
    %1 = vector.load %arg2[%c0_1, %c0_2] : memref<128x128xbf16, #tpu.memory_space<vmem>>, vector<128x128xbf16>
    %cst = arith.constant dense<0.000000e+00> : vector<128x128xf32>
    %2 = tpu.matmul %0, %1, %cst {dimension_numbers = #tpu.dot_dimension_numbers<[1], [0], [0], [1], [0, 0, 1, 1], [], []>} : vector<128x128xbf16>, vector<128x128xbf16>, vector<128x128xf32> -> vector<128x128xf32>
    %3 = arith.truncf %2 : vector<128x128xf32> to vector<128x128xbf16>
    %c0_3 = arith.constant 0 : index
    %c0_4 = arith.constant 0 : index
    %4 = vector.load %arg3[%c0_3, %c0_4] : memref<128x128xbf16, #tpu.memory_space<vmem>>, vector<128x128xbf16>
    tpu.vector_store %arg3[%c0_3, %c0_4], %3 {strides = array<i32>} : memref<128x128xbf16, #tpu.memory_space<vmem>>, vector<128x128xbf16>,
    return
  }
  func.func @transform_0(%arg0: i32) -> (i32, i32) {
    %c0_i32 = arith.constant 0 : i32
    %c0_i32_0 = arith.constant 0 : i32
    return %arg0, %c0_i32 : i32, i32
  }
  func.func @transform_1(%arg0: i32) -> (i32, i32) {
    %c0_i32 = arith.constant 0 : i32
    %c0_i32_0 = arith.constant 0 : i32
    %c0_i32_1 = arith.constant 0 : i32
    return %c0_i32, %c0_i32_0 : i32, i32
  }
  func.func @transform_2(%arg0: i32) -> (i32, i32) {
    %c0_i32 = arith.constant 0 : i32
    %c0_i32_0 = arith.constant 0 : i32
    return %arg0, %c0_i32 : i32, i32
  }
}

module attributes {stable_mosaic.version = 11 : i64} {
  func.func @prop_kernel(%arg0: i32, %arg1: i32, %arg2: memref<128x128xbf16, #tpu.memory_space<vmem>>, %arg3: memref<128x128xbf16, #tpu.memory_space<vmem>>, %arg4: memref<128x128xbf16, #tpu.memory_space<vmem>>, %arg5: memref<128x128xf32, #tpu.memory_space<vmem>>) attributes {dimension_semantics = [#tpu.dimension_semantics<parallel>, #tpu.dimension_semantics<arbitrary>], iteration_bounds = array<i64: 1, 1>, scalar_prefetch = 0 : i64, scratch_operands = 1 : i64, tpu.core_type = #tpu.core_type<tc>, window_params = [{transform_indices = @transform_0, window_bounds = array<i64: 128, 128>}, {transform_indices = @transform_1, window_bounds = array<i64: 128, 128>}, {transform_indices = @transform_2, window_bounds = array<i64: 128, 128>}]} {
    %c0_i32 = arith.constant 0 : i32
    %0 = arith.cmpi eq, %arg1, %c0_i32 : i32
    %1 = arith.extui %0 : i1 to i32
    %c0_i32_0 = arith.constant 0 : i32
    %2 = arith.cmpi ne, %1, %c0_i32_0 : i32
    scf.if %2 {
      %cst_10 = arith.constant 0.000000e+00 : f32
      %12 = vector.broadcast %cst_10 : f32 to vector<128x128xf32>
      %c0_11 = arith.constant 0 : index
      %c0_12 = arith.constant 0 : index
      %13 = vector.load %arg5[%c0_11, %c0_12] : memref<128x128xf32, #tpu.memory_space<vmem>>, vector<128x128xf32>
      tpu.vector_store %arg5[%c0_11, %c0_12], %12 {strides = array<i32>} : memref<128x128xf32, #tpu.memory_space<vmem>>, vector<128x128xf32>,
    } else {
    }
    %c0 = arith.constant 0 : index
    %c0_1 = arith.constant 0 : index
    %3 = vector.load %arg5[%c0, %c0_1] : memref<128x128xf32, #tpu.memory_space<vmem>>, vector<128x128xf32>
    %c0_2 = arith.constant 0 : index
    %c0_3 = arith.constant 0 : index
    %4 = vector.load %arg2[%c0_2, %c0_3] : memref<128x128xbf16, #tpu.memory_space<vmem>>, vector<128x128xbf16>
    %c0_4 = arith.constant 0 : index
    %c0_5 = arith.constant 0 : index
    %5 = vector.load %arg3[%c0_4, %c0_5] : memref<128x128xbf16, #tpu.memory_space<vmem>>, vector<128x128xbf16>
    %cst = arith.constant dense<0.000000e+00> : vector<128x128xf32>
    %6 = tpu.matmul %4, %5, %cst {dimension_numbers = #tpu.dot_dimension_numbers<[1], [0], [0], [1], [0, 0, 1, 1], [], []>} : vector<128x128xbf16>, vector<128x128xbf16>, vector<128x128xf32> -> vector<128x128xf32>
    %7 = arith.addf %3, %6 : vector<128x128xf32>
    %c0_6 = arith.constant 0 : index
    %c0_7 = arith.constant 0 : index
    %8 = vector.load %arg5[%c0_6, %c0_7] : memref<128x128xf32, #tpu.memory_space<vmem>>, vector<128x128xf32>
    tpu.vector_store %arg5[%c0_6, %c0_7], %7 {strides = array<i32>} : memref<128x128xf32, #tpu.memory_space<vmem>>, vector<128x128xf32>,
    %c0_i32_8 = arith.constant 0 : i32
    %9 = arith.cmpi eq, %arg1, %c0_i32_8 : i32
    %10 = arith.extui %9 : i1 to i32
    %c0_i32_9 = arith.constant 0 : i32
    %11 = arith.cmpi ne, %10, %c0_i32_9 : i32
    scf.if %11 {
      %c0_10 = arith.constant 0 : index
      %c0_11 = arith.constant 0 : index
      %12 = vector.load %arg5[%c0_10, %c0_11] : memref<128x128xf32, #tpu.memory_space<vmem>>, vector<128x128xf32>
      %13 = arith.truncf %12 : vector<128x128xf32> to vector<128x128xbf16>
      %c0_12 = arith.constant 0 : index
      %c0_13 = arith.constant 0 : index
      %14 = vector.load %arg4[%c0_12, %c0_13] : memref<128x128xbf16, #tpu.memory_space<vmem>>, vector<128x128xbf16>
      tpu.vector_store %arg4[%c0_12, %c0_13], %13 {strides = array<i32>} : memref<128x128xbf16, #tpu.memory_space<vmem>>, vector<128x128xbf16>,
    } else {
    }
    return
  }
  func.func @transform_0(%arg0: i32, %arg1: i32) -> (i32, i32) {
    %c0_i32 = arith.constant 0 : i32
    return %arg0, %arg1 : i32, i32
  }
  func.func @transform_1(%arg0: i32, %arg1: i32) -> (i32, i32) {
    %c0_i32 = arith.constant 0 : i32
    %c0_i32_0 = arith.constant 0 : i32
    return %arg1, %c0_i32 : i32, i32
  }
  func.func @transform_2(%arg0: i32, %arg1: i32) -> (i32, i32) {
    %c0_i32 = arith.constant 0 : i32
    %c0_i32_0 = arith.constant 0 : i32
    return %arg0, %c0_i32 : i32, i32
  }
}

module attributes {stable_mosaic.version = 11 : i64} {
  func.func @prop_bias_logsoftmax_kernel(%arg0: i32, %arg1: i32, %arg2: memref<128x128xbf16, #tpu.memory_space<vmem>>, %arg3: memref<128x128xbf16, #tpu.memory_space<vmem>>, %arg4: memref<1x128xf32, #tpu.memory_space<vmem>>, %arg5: memref<128x128xf32, #tpu.memory_space<vmem>>, %arg6: memref<128x128xf32, #tpu.memory_space<vmem>>) attributes {dimension_semantics = [#tpu.dimension_semantics<parallel>, #tpu.dimension_semantics<arbitrary>], iteration_bounds = array<i64: 1, 1>, scalar_prefetch = 0 : i64, scratch_operands = 1 : i64, tpu.core_type = #tpu.core_type<tc>, window_params = [{transform_indices = @transform_0, window_bounds = array<i64: 128, 128>}, {transform_indices = @transform_1, window_bounds = array<i64: 128, 128>}, {pipeline_mode = #tpu.pipeline_mode<synchronous>, transform_indices = @transform_2, window_bounds = array<i64: 1, 128>}, {transform_indices = @transform_3, window_bounds = array<i64: 128, 128>}]} {
    %c0_i32 = arith.constant 0 : i32
    %0 = arith.cmpi eq, %arg1, %c0_i32 : i32
    %1 = arith.extui %0 : i1 to i32
    %c0_i32_0 = arith.constant 0 : i32
    %2 = arith.cmpi ne, %1, %c0_i32_0 : i32
    scf.if %2 {
      %cst_10 = arith.constant 0.000000e+00 : f32
      %12 = vector.broadcast %cst_10 : f32 to vector<128x128xf32>
      %c0_11 = arith.constant 0 : index
      %c0_12 = arith.constant 0 : index
      %13 = vector.load %arg6[%c0_11, %c0_12] : memref<128x128xf32, #tpu.memory_space<vmem>>, vector<128x128xf32>
      tpu.vector_store %arg6[%c0_11, %c0_12], %12 {strides = array<i32>} : memref<128x128xf32, #tpu.memory_space<vmem>>, vector<128x128xf32>,
    } else {
    }
    %c0 = arith.constant 0 : index
    %c0_1 = arith.constant 0 : index
    %3 = vector.load %arg6[%c0, %c0_1] : memref<128x128xf32, #tpu.memory_space<vmem>>, vector<128x128xf32>
    %c0_2 = arith.constant 0 : index
    %c0_3 = arith.constant 0 : index
    %4 = vector.load %arg2[%c0_2, %c0_3] : memref<128x128xbf16, #tpu.memory_space<vmem>>, vector<128x128xbf16>
    %c0_4 = arith.constant 0 : index
    %c0_5 = arith.constant 0 : index
    %5 = vector.load %arg3[%c0_4, %c0_5] : memref<128x128xbf16, #tpu.memory_space<vmem>>, vector<128x128xbf16>
    %cst = arith.constant dense<0.000000e+00> : vector<128x128xf32>
    %6 = tpu.matmul %4, %5, %cst {dimension_numbers = #tpu.dot_dimension_numbers<[1], [0], [0], [1], [0, 0, 1, 1], [], []>} : vector<128x128xbf16>, vector<128x128xbf16>, vector<128x128xf32> -> vector<128x128xf32>
    %7 = arith.addf %3, %6 : vector<128x128xf32>
    %c0_6 = arith.constant 0 : index
    %c0_7 = arith.constant 0 : index
    %8 = vector.load %arg6[%c0_6, %c0_7] : memref<128x128xf32, #tpu.memory_space<vmem>>, vector<128x128xf32>
    tpu.vector_store %arg6[%c0_6, %c0_7], %7 {strides = array<i32>} : memref<128x128xf32, #tpu.memory_space<vmem>>, vector<128x128xf32>,
    %c0_i32_8 = arith.constant 0 : i32
    %9 = arith.cmpi eq, %arg1, %c0_i32_8 : i32
    %10 = arith.extui %9 : i1 to i32
    %c0_i32_9 = arith.constant 0 : i32
    %11 = arith.cmpi ne, %10, %c0_i32_9 : i32
    scf.if %11 {
      %c0_10 = arith.constant 0 : index
      %c0_11 = arith.constant 0 : index
      %12 = vector.load %arg6[%c0_10, %c0_11] : memref<128x128xf32, #tpu.memory_space<vmem>>, vector<128x128xf32>
      %c0_12 = arith.constant 0 : index
      %c0_13 = arith.constant 0 : index
      %13 = vector.load %arg4[%c0_12, %c0_13] : memref<1x128xf32, #tpu.memory_space<vmem>>, vector<1x128xf32>
      %14 = vector.broadcast %13 : vector<1x128xf32> to vector<128x128xf32>
      %15 = arith.addf %12, %14 : vector<128x128xf32>
      %cst_14 = arith.constant dense<0xFF800000> : vector<128xf32>
      %16 = vector.multi_reduction <maximumf>, %15, %cst_14 [1] : vector<128x128xf32> to vector<128xf32>
      %17 = vector.shape_cast %16 : vector<128xf32> to vector<128x1xf32>
      %18 = vector.broadcast %17 : vector<128x1xf32> to vector<128x128xf32>
      %19 = arith.subf %15, %18 : vector<128x128xf32>
      %20 = math.exp %19 : vector<128x128xf32>
      %cst_15 = arith.constant dense<0.000000e+00> : vector<128xf32>
      %21 = vector.multi_reduction <add>, %20, %cst_15 [1] : vector<128x128xf32> to vector<128xf32>
      %22 = vector.shape_cast %21 : vector<128xf32> to vector<128x1xf32>
      %23 = math.log %22 : vector<128x1xf32>
      %24 = arith.addf %23, %17 : vector<128x1xf32>
      %25 = vector.broadcast %24 : vector<128x1xf32> to vector<128x128xf32>
      %26 = arith.subf %15, %25 : vector<128x128xf32>
      %c0_16 = arith.constant 0 : index
      %c0_17 = arith.constant 0 : index
      %27 = vector.load %arg5[%c0_16, %c0_17] : memref<128x128xf32, #tpu.memory_space<vmem>>, vector<128x128xf32>
      tpu.vector_store %arg5[%c0_16, %c0_17], %26 {strides = array<i32>} : memref<128x128xf32, #tpu.memory_space<vmem>>, vector<128x128xf32>,
    } else {
    }
    return
  }
  func.func @transform_0(%arg0: i32, %arg1: i32) -> (i32, i32) {
    %c0_i32 = arith.constant 0 : i32
    return %arg0, %arg1 : i32, i32
  }
  func.func @transform_1(%arg0: i32, %arg1: i32) -> (i32, i32) {
    %c0_i32 = arith.constant 0 : i32
    %c0_i32_0 = arith.constant 0 : i32
    return %arg1, %c0_i32 : i32, i32
  }
  func.func @transform_2(%arg0: i32, %arg1: i32) -> (i32, i32) {
    %c0_i32 = arith.constant 0 : i32
    %c0_i32_0 = arith.constant 0 : i32
    %c0_i32_1 = arith.constant 0 : i32
    return %c0_i32, %c0_i32_0 : i32, i32
  }
  func.func @transform_3(%arg0: i32, %arg1: i32) -> (i32, i32) {
    %c0_i32 = arith.constant 0 : i32
    %c0_i32_0 = arith.constant 0 : i32
    return %arg0, %c0_i32 : i32, i32
  }
}

</mosaic_0001>

<bundles_post_ra>
// kernel: _sgcnet_forward_impl.3
= control target key start
LH: loop header
LB: loop body
LE: loop exit
PB: predicated region body
PF: predicated region fallthrough
CT: control target
= control target key end

     0   :  { %s462_s1 = inlined_call_operand.vmem [shape: bf16[128,128], index: 1, kind: input, shape index: {}]   ;;  %s463_s0 = inlined_call_operand.vmem [shape: bf16[128,128], index: 0, kind: input, shape index: {}]   ;;  %s464_s2 = inlined_call_operand.vmem [shape: bf16[128,128], index: 2, kind: output, shape index: {}]  }
   0x1   :  { %v303_v0 = vld [vmem:[%s462_s1 + $0x38] sm:$0xff]  ;;  %v302_v1 = vld [vmem:[%s462_s1 + $0x30] sm:$0xff]  ;;  %v301_v2 = vld [vmem:[%s462_s1 + $0x28] sm:$0xff] }
   0x2   :  { %139 = vmatpush.bf16.msra.mxu0 %v303_v0  ;;  %351 = vmatpush.bf16.msra.mxu1 %v303_v0  ;;  %v300_v3 = vld [vmem:[%s462_s1 + $0x20] sm:$0xff]  ;;  %v299_v4 = vld [vmem:[%s462_s1 + $0x18] sm:$0xff]  ;;  %v298_v5 = vld [vmem:[%s462_s1 + $0x10] sm:$0xff] }
   0x3   :  { %352 = vmatpush.bf16.msra.mxu2 %v303_v0  ;;  %353 = vmatpush.bf16.msra.mxu3 %v303_v0  ;;  %v297_v6 = vld [vmem:[%s462_s1 + $0x8] sm:$0xff]  ;;  %v296_v7 = vld [vmem:[%s462_s1] sm:$0xff]  ;;  %v290_v9 = vld [vmem:[%s463_s0 + $0x10] sm:$0xff] }
   0x4   :  { %v288_v8 = vld [vmem:[%s463_s0] sm:$0xff]  ;;  %v294_v11 = vld [vmem:[%s463_s0 + $0x30] sm:$0xff]  ;;  %v289_v12 = vld [vmem:[%s463_s0 + $0x8] sm:$0xff] }
   0x5   :  { %v292_v10 = vld [vmem:[%s463_s0 + $0x20] sm:$0xff]  ;;  %v291_v13 = vld [vmem:[%s463_s0 + $0x18] sm:$0xff]  ;;  %v293_v14 = vld [vmem:[%s463_s0 + $0x28] sm:$0xff] }
   0x6   :  { %140 = vmatpush.bf16.msra.mxu0 %v302_v1  ;;  %354 = vmatpush.bf16.msra.mxu1 %v302_v1  ;;  %v295_v15 = vld [vmem:[%s463_s0 + $0x38] sm:$0xff] }
   0x7   :  { %355 = vmatpush.bf16.msra.mxu2 %v302_v1  ;;  %356 = vmatpush.bf16.msra.mxu3 %v302_v1 }
   0xa   :  { %141 = vmatpush.bf16.msra.mxu0 %v301_v2  ;;  %357 = vmatpush.bf16.msra.mxu1 %v301_v2 }
   0xb   :  { %358 = vmatpush.bf16.msra.mxu2 %v301_v2  ;;  %359 = vmatpush.bf16.msra.mxu3 %v301_v2 }
   0xe   :  { %142 = vmatpush.bf16.msra.mxu0 %v300_v3  ;;  %360 = vmatpush.bf16.msra.mxu1 %v300_v3 }
   0xf   :  { %361 = vmatpush.bf16.msra.mxu2 %v300_v3  ;;  %362 = vmatpush.bf16.msra.mxu3 %v300_v3 }
  0x12   :  { %143 = vmatpush.bf16.msra.mxu0 %v299_v4  ;;  %363 = vmatpush.bf16.msra.mxu1 %v299_v4 }
  0x13   :  { %364 = vmatpush.bf16.msra.mxu2 %v299_v4  ;;  %365 = vmatpush.bf16.msra.mxu3 %v299_v4 }
  0x16   :  { %144 = vmatpush.bf16.msra.mxu0 %v298_v5  ;;  %366 = vmatpush.bf16.msra.mxu1 %v298_v5 }
  0x17   :  { %367 = vmatpush.bf16.msra.mxu2 %v298_v5  ;;  %368 = vmatpush.bf16.msra.mxu3 %v298_v5 }
  0x1a   :  { %145 = vmatpush.bf16.msra.mxu0 %v297_v6  ;;  %369 = vmatpush.bf16.msra.mxu1 %v297_v6 }
  0x1b   :  { %370 = vmatpush.bf16.msra.mxu2 %v297_v6  ;;  %371 = vmatpush.bf16.msra.mxu3 %v297_v6 }
  0x1e   :  { %146 = vmatpush.bf16.msra.mxu0 %v296_v7  ;;  %372 = vmatpush.bf16.msra.mxu1 %v296_v7 }
  0x1f   :  { %373 = vmatpush.bf16.msra.mxu2 %v296_v7  ;;  %374 = vmatpush.bf16.msra.mxu3 %v296_v7 }
  0x21   :  { %147 = vmatmul.bf16.vlgmr.msra.gmra.mxu0 %v288_v8  ;;  %157 = vmatmul.bf16.vlgmr.msra.gmra.mxu1 %v290_v9 }
  0x22   :  { %167 = vmatmul.bf16.vlgmr.msra.gmra.mxu2 %v292_v10  ;;  %177 = vmatmul.bf16.vlgmr.msra.gmra.mxu3 %v294_v11 }
  0x31   :  { %152 = vmatmul.bf16.gmra.mxu0 %v289_v12  ;;  %162 = vmatmul.bf16.gmra.mxu1 %v291_v13 }
  0x32   :  { %172 = vmatmul.bf16.gmra.mxu2 %v293_v14  ;;  %182 = vmatmul.bf16.gmra.mxu3 %v295_v15 }
  0x9e   :  { %v148_v16 = vpop.f32.mrf.mxu0  ;;  %v158_v17 = vpop.f32.mrf.mxu1 }
  0xa5   :  { %v168_v18 = vpop.f32.mrf.mxu2  ;;  %v178_v19 = vpop.f32.mrf.mxu3 }
  0xa6   :  { %v150_v20 = vpop.f32.mrf.mxu0  ;;  %v160_v21 = vpop.f32.mrf.mxu1 }
  0xa7   :  { %v307_v22 = vpack.c.bf16 %v150_v20, %v148_v16  ;;  %v317_v23 = vpack.c.bf16 %v160_v21, %v158_v17 }
  0xa9   :  { %308 = vst [vmem:[%s464_s2] sm:$0xff] %v307_v22  }
  0xaa   :  { %345 = vst [vmem:[%s464_s2 + $0x10] sm:$0xff] %v317_v23  }
  0xad   :  { %v170_v24 = vpop.f32.mrf.mxu2  ;;  %v180_v25 = vpop.f32.mrf.mxu3 }
  0xae   :  { %v327_v26 = vpack.c.bf16 %v170_v24, %v168_v18  ;;  %v337_v27 = vpack.c.bf16 %v180_v25, %v178_v19  ;;  %v153_v28 = vpop.f32.mrf.mxu0  ;;  %v163_v29 = vpop.f32.mrf.mxu1 }
  0xb0   :  { %347 = vst [vmem:[%s464_s2 + $0x20] sm:$0xff] %v327_v26  }
  0xb1   :  { %349 = vst [vmem:[%s464_s2 + $0x30] sm:$0xff] %v337_v27  }
  0xb5   :  { %v173_v30 = vpop.f32.mrf.mxu2  ;;  %v183_v31 = vpop.f32.mrf.mxu3 }
  0xb6   :  { %v155_v32 = vpop.f32.mrf.mxu0  ;;  %v165_v33 = vpop.f32.mrf.mxu1 }
  0xb7   :  { %v312_v34 = vpack.c.bf16 %v155_v32, %v153_v28  ;;  %v322_v35 = vpack.c.bf16 %v165_v33, %v163_v29 }
  0xb9   :  { %344 = vst [vmem:[%s464_s2 + $0x8] sm:$0xff] %v312_v34  }
  0xba   :  { %346 = vst [vmem:[%s464_s2 + $0x18] sm:$0xff] %v322_v35  }
  0xbd   :  { %v175_v36 = vpop.f32.mrf.mxu2  ;;  %v185_v37 = vpop.f32.mrf.mxu3 }
  0xbe   :  { %v332_v38 = vpack.c.bf16 %v175_v36, %v173_v30  ;;  %v342_v39 = vpack.c.bf16 %v185_v37, %v183_v31 }
  0xc0   :  { %348 = vst [vmem:[%s464_s2 + $0x28] sm:$0xff] %v332_v38  }
  0xc1   :  { %350 = vst [vmem:[%s464_s2 + $0x38] sm:$0xff] %v342_v39  }

// kernel: _sgcnet_forward_impl.4
= control target key start
LH: loop header
LB: loop body
LE: loop exit
PB: predicated region body
PF: predicated region fallthrough
CT: control target
= control target key end

     0   :  { %s549_s1 = inlined_call_operand.vmem [shape: bf16[128,128], index: 1, kind: input, shape index: {}]   ;;  %s550_s0 = inlined_call_operand.vmem [shape: bf16[128,128], index: 0, kind: input, shape index: {}]   ;;  %s551_s2 = inlined_call_operand.vmem [shape: bf16[128,128], index: 2, kind: output, shape index: {}]  }
   0x1   :  { %v390_v0 = vld [vmem:[%s549_s1 + $0x38] sm:$0xff]  ;;  %v389_v1 = vld [vmem:[%s549_s1 + $0x30] sm:$0xff]  ;;  %v388_v2 = vld [vmem:[%s549_s1 + $0x28] sm:$0xff] }
   0x2   :  { %175 = vmatpush.bf16.msra.mxu0 %v390_v0  ;;  %438 = vmatpush.bf16.msra.mxu1 %v390_v0  ;;  %v387_v3 = vld [vmem:[%s549_s1 + $0x20] sm:$0xff]  ;;  %v386_v4 = vld [vmem:[%s549_s1 + $0x18] sm:$0xff]  ;;  %v385_v5 = vld [vmem:[%s549_s1 + $0x10] sm:$0xff] }
   0x3   :  { %439 = vmatpush.bf16.msra.mxu2 %v390_v0  ;;  %440 = vmatpush.bf16.msra.mxu3 %v390_v0  ;;  %v384_v6 = vld [vmem:[%s549_s1 + $0x8] sm:$0xff]  ;;  %v383_v7 = vld [vmem:[%s549_s1] sm:$0xff]  ;;  %v377_v9 = vld [vmem:[%s550_s0 + $0x10] sm:$0xff] }
   0x4   :  { %v375_v8 = vld [vmem:[%s550_s0] sm:$0xff]  ;;  %v381_v11 = vld [vmem:[%s550_s0 + $0x30] sm:$0xff]  ;;  %v376_v12 = vld [vmem:[%s550_s0 + $0x8] sm:$0xff] }
   0x5   :  { %v379_v10 = vld [vmem:[%s550_s0 + $0x20] sm:$0xff]  ;;  %v378_v13 = vld [vmem:[%s550_s0 + $0x18] sm:$0xff]  ;;  %v380_v14 = vld [vmem:[%s550_s0 + $0x28] sm:$0xff] }
   0x6   :  { %176 = vmatpush.bf16.msra.mxu0 %v389_v1  ;;  %441 = vmatpush.bf16.msra.mxu1 %v389_v1  ;;  %v382_v15 = vld [vmem:[%s550_s0 + $0x38] sm:$0xff] }
   0x7   :  { %442 = vmatpush.bf16.msra.mxu2 %v389_v1  ;;  %443 = vmatpush.bf16.msra.mxu3 %v389_v1 }
   0xa   :  { %177 = vmatpush.bf16.msra.mxu0 %v388_v2  ;;  %444 = vmatpush.bf16.msra.mxu1 %v388_v2 }
   0xb   :  { %445 = vmatpush.bf16.msra.mxu2 %v388_v2  ;;  %446 = vmatpush.bf16.msra.mxu3 %v388_v2 }
   0xe   :  { %178 = vmatpush.bf16.msra.mxu0 %v387_v3  ;;  %447 = vmatpush.bf16.msra.mxu1 %v387_v3 }
   0xf   :  { %448 = vmatpush.bf16.msra.mxu2 %v387_v3  ;;  %449 = vmatpush.bf16.msra.mxu3 %v387_v3 }
  0x12   :  { %179 = vmatpush.bf16.msra.mxu0 %v386_v4  ;;  %450 = vmatpush.bf16.msra.mxu1 %v386_v4 }
  0x13   :  { %451 = vmatpush.bf16.msra.mxu2 %v386_v4  ;;  %452 = vmatpush.bf16.msra.mxu3 %v386_v4 }
  0x16   :  { %180 = vmatpush.bf16.msra.mxu0 %v385_v5  ;;  %453 = vmatpush.bf16.msra.mxu1 %v385_v5 }
  0x17   :  { %454 = vmatpush.bf16.msra.mxu2 %v385_v5  ;;  %455 = vmatpush.bf16.msra.mxu3 %v385_v5 }
  0x1a   :  { %181 = vmatpush.bf16.msra.mxu0 %v384_v6  ;;  %456 = vmatpush.bf16.msra.mxu1 %v384_v6 }
  0x1b   :  { %457 = vmatpush.bf16.msra.mxu2 %v384_v6  ;;  %458 = vmatpush.bf16.msra.mxu3 %v384_v6 }
  0x1e   :  { %182 = vmatpush.bf16.msra.mxu0 %v383_v7  ;;  %459 = vmatpush.bf16.msra.mxu1 %v383_v7 }
  0x1f   :  { %460 = vmatpush.bf16.msra.mxu2 %v383_v7  ;;  %461 = vmatpush.bf16.msra.mxu3 %v383_v7 }
  0x21   :  { %183 = vmatmul.bf16.vlgmr.msra.gmra.mxu0 %v375_v8  ;;  %193 = vmatmul.bf16.vlgmr.msra.gmra.mxu1 %v377_v9 }
  0x22   :  { %203 = vmatmul.bf16.vlgmr.msra.gmra.mxu2 %v379_v10  ;;  %213 = vmatmul.bf16.vlgmr.msra.gmra.mxu3 %v381_v11 }
  0x31   :  { %188 = vmatmul.bf16.gmra.mxu0 %v376_v12  ;;  %198 = vmatmul.bf16.gmra.mxu1 %v378_v13 }
  0x32   :  { %208 = vmatmul.bf16.gmra.mxu2 %v380_v14  ;;  %218 = vmatmul.bf16.gmra.mxu3 %v382_v15 }
  0x9e   :  { %v184_v16 = vpop.f32.mrf.mxu0  ;;  %v194_v17 = vpop.f32.mrf.mxu1 }
  0xa5   :  { %v204_v18 = vpop.f32.mrf.mxu2  ;;  %v214_v19 = vpop.f32.mrf.mxu3 }
  0xa6   :  { %v186_v20 = vpop.f32.mrf.mxu0  ;;  %v196_v21 = vpop.f32.mrf.mxu1 }
  0xa7   :  { %v394_v22 = vpack.c.bf16 %v186_v20, %v184_v16  ;;  %v404_v23 = vpack.c.bf16 %v196_v21, %v194_v17 }
  0xa9   :  { %395 = vst [vmem:[%s551_s2] sm:$0xff] %v394_v22  }
  0xaa   :  { %432 = vst [vmem:[%s551_s2 + $0x10] sm:$0xff] %v404_v23  }
  0xad   :  { %v206_v24 = vpop.f32.mrf.mxu2  ;;  %v216_v25 = vpop.f32.mrf.mxu3 }
  0xae   :  { %v414_v26 = vpack.c.bf16 %v206_v24, %v204_v18  ;;  %v424_v27 = vpack.c.bf16 %v216_v25, %v214_v19  ;;  %v189_v28 = vpop.f32.mrf.mxu0  ;;  %v199_v29 = vpop.f32.mrf.mxu1 }
  0xb0   :  { %434 = vst [vmem:[%s551_s2 + $0x20] sm:$0xff] %v414_v26  }
  0xb1   :  { %436 = vst [vmem:[%s551_s2 + $0x30] sm:$0xff] %v424_v27  }
  0xb5   :  { %v209_v30 = vpop.f32.mrf.mxu2  ;;  %v219_v31 = vpop.f32.mrf.mxu3 }
  0xb6   :  { %v191_v32 = vpop.f32.mrf.mxu0  ;;  %v201_v33 = vpop.f32.mrf.mxu1 }
  0xb7   :  { %v399_v34 = vpack.c.bf16 %v191_v32, %v189_v28  ;;  %v409_v35 = vpack.c.bf16 %v201_v33, %v199_v29 }
  0xb9   :  { %431 = vst [vmem:[%s551_s2 + $0x8] sm:$0xff] %v399_v34  }
  0xba   :  { %433 = vst [vmem:[%s551_s2 + $0x18] sm:$0xff] %v409_v35  }
  0xbd   :  { %v211_v36 = vpop.f32.mrf.mxu2  ;;  %v221_v37 = vpop.f32.mrf.mxu3 }
  0xbe   :  { %v419_v38 = vpack.c.bf16 %v211_v36, %v209_v30  ;;  %v429_v39 = vpack.c.bf16 %v221_v37, %v219_v31 }
  0xc0   :  { %435 = vst [vmem:[%s551_s2 + $0x28] sm:$0xff] %v419_v38  }
  0xc1   :  { %437 = vst [vmem:[%s551_s2 + $0x38] sm:$0xff] %v429_v39  }

// kernel: _sgcnet_forward_impl.5
= control target key start
LH: loop header
LB: loop body
LE: loop exit
PB: predicated region body
PF: predicated region fallthrough
CT: control target
= control target key end

     0   :  { %s926_s1 = inlined_call_operand.vmem [shape: bf16[128,128], index: 1, kind: input, shape index: {}]   ;;  %s927_s2 = inlined_call_operand.vmem [shape: f32[1,128], index: 2, kind: input, shape index: {}]   ;;  %s928_s0 = inlined_call_operand.vmem [shape: bf16[128,128], index: 0, kind: input, shape index: {}]   ;;  %s929_s3 = inlined_call_operand.vmem [shape: f32[128,128], index: 3, kind: output, shape index: {}]  }
   0x1   :  { %v573_v0 = vld [vmem:[%s926_s1 + $0x38] sm:$0xff]  ;;  %v572_v1 = vld [vmem:[%s926_s1 + $0x30] sm:$0xff]  ;;  %v571_v2 = vld [vmem:[%s926_s1 + $0x28] sm:$0xff] }
   0x2   :  { %178 = vmatpush.bf16.msra.mxu0 %v573_v0  ;;  %574 = vmatpush.bf16.msra.mxu1 %v573_v0  ;;  %v570_v3 = vld [vmem:[%s926_s1 + $0x20] sm:$0xff]  ;;  %v569_v4 = vld [vmem:[%s926_s1 + $0x18] sm:$0xff]  ;;  %v568_v5 = vld [vmem:[%s926_s1 + $0x10] sm:$0xff] }
   0x3   :  { %575 = vmatpush.bf16.msra.mxu2 %v573_v0  ;;  %576 = vmatpush.bf16.msra.mxu3 %v573_v0  ;;  %v567_v6 = vld [vmem:[%s926_s1 + $0x8] sm:$0xff]  ;;  %v566_v7 = vld [vmem:[%s926_s1] sm:$0xff]  ;;  %v560_v9 = vld [vmem:[%s928_s0 + $0x10] sm:$0xff] }
   0x4   :  { %v558_v8 = vld [vmem:[%s928_s0] sm:$0xff]  ;;  %v564_v11 = vld [vmem:[%s928_s0 + $0x30] sm:$0xff]  ;;  %v559_v12 = vld [vmem:[%s928_s0 + $0x8] sm:$0xff] }
   0x5   :  { %v562_v10 = vld [vmem:[%s928_s0 + $0x20] sm:$0xff]  ;;  %v561_v13 = vld [vmem:[%s928_s0 + $0x18] sm:$0xff]  ;;  %v563_v14 = vld [vmem:[%s928_s0 + $0x28] sm:$0xff] }
   0x6   :  { %179 = vmatpush.bf16.msra.mxu0 %v572_v1  ;;  %577 = vmatpush.bf16.msra.mxu1 %v572_v1  ;;  %v565_v15 = vld [vmem:[%s928_s0 + $0x38] sm:$0xff]  ;;  %v598_v16 = vld [vmem:[%s927_s2] ss:$0 sm:$0xff] }
   0x7   :  { %578 = vmatpush.bf16.msra.mxu2 %v572_v1  ;;  %579 = vmatpush.bf16.msra.mxu3 %v572_v1 }
   0xa   :  { %180 = vmatpush.bf16.msra.mxu0 %v571_v2  ;;  %580 = vmatpush.bf16.msra.mxu1 %v571_v2 }
   0xb   :  { %581 = vmatpush.bf16.msra.mxu2 %v571_v2  ;;  %582 = vmatpush.bf16.msra.mxu3 %v571_v2 }
   0xe   :  { %181 = vmatpush.bf16.msra.mxu0 %v570_v3  ;;  %583 = vmatpush.bf16.msra.mxu1 %v570_v3 }
   0xf   :  { %584 = vmatpush.bf16.msra.mxu2 %v570_v3  ;;  %585 = vmatpush.bf16.msra.mxu3 %v570_v3 }
  0x12   :  { %182 = vmatpush.bf16.msra.mxu0 %v569_v4  ;;  %586 = vmatpush.bf16.msra.mxu1 %v569_v4 }
  0x13   :  { %587 = vmatpush.bf16.msra.mxu2 %v569_v4  ;;  %588 = vmatpush.bf16.msra.mxu3 %v569_v4 }
  0x16   :  { %183 = vmatpush.bf16.msra.mxu0 %v568_v5  ;;  %589 = vmatpush.bf16.msra.mxu1 %v568_v5 }
  0x17   :  { %590 = vmatpush.bf16.msra.mxu2 %v568_v5  ;;  %591 = vmatpush.bf16.msra.mxu3 %v568_v5 }
  0x1a   :  { %184 = vmatpush.bf16.msra.mxu0 %v567_v6  ;;  %592 = vmatpush.bf16.msra.mxu1 %v567_v6 }
  0x1b   :  { %593 = vmatpush.bf16.msra.mxu2 %v567_v6  ;;  %594 = vmatpush.bf16.msra.mxu3 %v567_v6 }
  0x1e   :  { %185 = vmatpush.bf16.msra.mxu0 %v566_v7  ;;  %595 = vmatpush.bf16.msra.mxu1 %v566_v7 }
  0x1f   :  { %596 = vmatpush.bf16.msra.mxu2 %v566_v7  ;;  %597 = vmatpush.bf16.msra.mxu3 %v566_v7 }
  0x21   :  { %186 = vmatmul.bf16.vlgmr.msra.gmra.mxu0 %v558_v8  ;;  %196 = vmatmul.bf16.vlgmr.msra.gmra.mxu1 %v560_v9 }
  0x22   :  { %206 = vmatmul.bf16.vlgmr.msra.gmra.mxu2 %v562_v10  ;;  %216 = vmatmul.bf16.vlgmr.msra.gmra.mxu3 %v564_v11 }
  0x31   :  { %191 = vmatmul.bf16.gmra.mxu0 %v559_v12  ;;  %201 = vmatmul.bf16.gmra.mxu1 %v561_v13 }
  0x32   :  { %211 = vmatmul.bf16.gmra.mxu2 %v563_v14  ;;  %221 = vmatmul.bf16.gmra.mxu3 %v565_v15 }
  0x9e   :  { %v187_v17 = vpop.f32.mrf.mxu0  ;;  %v197_v18 = vpop.f32.mrf.mxu1 }
  0x9f   :  { %v734_v19 = vadd.f32 %v598_v16, %v187_v17  ;;  %v736_v20 = vadd.f32 %v598_v16, %v197_v18 }
  0xa1   :  { %306 = vmax.xlane.f32.xlu2 %v736_v20  ;;  %298 = vmax.xlane.f32.xlu0 %v734_v19 }
  0xa5   :  { %v207_v21 = vpop.f32.mrf.mxu2  ;;  %v217_v22 = vpop.f32.mrf.mxu3 }
  0xa6   :  { %v740_v23 = vadd.f32 %v598_v16, %v207_v21  ;;  %v742_v24 = vadd.f32 %v598_v16, %v217_v22  ;;  %v189_v25 = vpop.f32.mrf.mxu0  ;;  %v199_v26 = vpop.f32.mrf.mxu1 }
  0xa7   :  { %v746_v29 = vadd.f32 %v598_v16, %v189_v25  ;;  %v748_v30 = vadd.f32 %v598_v16, %v199_v26 }
  0xa9   :  { %314 = vmax.xlane.f32.xlu2 %v740_v23  ;;  %322 = vmax.xlane.f32.xlu0 %v742_v24 }
  0xad   :  { %v209_v27 = vpop.f32.mrf.mxu2  ;;  %v219_v32 = vpop.f32.mrf.mxu3 }
  0xae   :  { %v192_v28 = vpop.f32.mrf.mxu0  ;;  %v757_v35 = vadd.f32 %v598_v16, %v209_v27  ;;  %v202_v37 = vpop.f32.mrf.mxu1  ;;  %v779_v48 = vadd.f32 %v598_v16, %v219_v32 }
  0xaf   :  { %v750_v31 = vadd.f32 %v598_v16, %v192_v28  ;;  %v761_v39 = vadd.f32 %v598_v16, %v202_v37 }
  0xb1   :  { %308 = vmax.xlane.f32.xlu2 %v748_v30  ;;  %300 = vmax.xlane.f32.xlu0 %v746_v29 }
  0xb2   :  { %302 = vmax.xlane.f32.xlu1 %v750_v31 }
  0xb5   :  { %v212_v33 = vpop.f32.mrf.mxu2  ;;  %v222_v36 = vpop.f32.mrf.mxu3 }
  0xb6   :  { %v755_v34 = vadd.f32 %v598_v16, %v212_v33  ;;  %v194_v38 = vpop.f32.mrf.mxu0  ;;  %v770_v44 = vadd.f32 %v598_v16, %v222_v36  ;;  %v204_v45 = vpop.f32.mrf.mxu1 }
  0xb7   :  { %v765_v42 = vadd.f32 %v598_v16, %v194_v38  ;;  %v774_v47 = vadd.f32 %v598_v16, %v204_v45 }
  0xb9   :  { %316 = vmax.xlane.f32.xlu0 %v757_v35 }
  0xba   :  { %318 = vmax.xlane.f32.xlu1 %v755_v34 }
  0xbd   :  { %v214_v40 = vpop.f32.mrf.mxu2  ;;  %v224_v43 = vpop.f32.mrf.mxu3 }
  0xbe   :  { %v763_v41 = vadd.f32 %v598_v16, %v214_v40  ;;  %v772_v46 = vadd.f32 %v598_v16, %v224_v43 }
  0xc0   :  { %320 = vmax.xlane.f32.xlu2 %v763_v41 }
  0xc1   :  { %310 = vmax.xlane.f32.xlu0 %v761_v39 }
  0xc2   :  { %304 = vmax.xlane.f32.xlu1 %v765_v42 }
  0xc8   :  { %326 = vmax.xlane.f32.xlu2 %v770_v44 }
  0xc9   :  { %328 = vmax.xlane.f32.xlu0 %v772_v46 }
  0xca   :  { %312 = vmax.xlane.f32.xlu1 %v774_v47 }
  0xd2   :  { %324 = vmax.xlane.f32.xlu1 %v779_v48 }
 0x114   :  { %v782_v49 = vpop.xlane.xlu2 %306  ;;  %v784_v50 = vpop.xlane.xlu0 %298 }
 0x115   :  { %v334_v51 = vsub.f32 %v736_v20, %v782_v49  ;;  %v330_v52 = vsub.f32 %v734_v19, %v784_v50 }
 0x117   :  { %v354_v53 = vmul.f32 1.442695, %v334_v51  ;;  %v346_v54 = vmul.f32 1.442695, %v330_v52 }
 0x119   :  { %599 = vpow2.f32 %v354_v53 }
 0x11a   :  { %601 = vpow2.f32 %v346_v54 }
 0x11c   :  { %v790_v55 = vpop.xlane.xlu2 %314  ;;  %v792_v56 = vpop.xlane.xlu0 %322 }
 0x11d   :  { %v338_v57 = vsub.f32 %v740_v23, %v790_v55  ;;  %v342_v58 = vsub.f32 %v742_v24, %v792_v56 }
 0x11f   :  { %v600_v59 = vpop.eup %599  ;;  %v362_v60 = vmul.f32 1.442695, %v338_v57  ;;  %v370_v61 = vmul.f32 1.442695, %v342_v58 }
 0x120   :  { %v602_v62 = vpop.eup %601  ;;  %386 = vadd.xlane.f32.xlu2 %v600_v59 }
 0x121   :  { %603 = vpow2.f32 %v362_v60  ;;  %378 = vadd.xlane.f32.xlu1 %v602_v62 }
 0x122   :  { %605 = vpow2.f32 %v370_v61 }
 0x124   :  { %v798_v63 = vpop.xlane.xlu2 %308  ;;  %v800_v0 = vpop.xlane.xlu0 %300 }
 0x125   :  { %v335_v1 = vsub.f32 %v748_v30, %v798_v63  ;;  %v331_v2 = vsub.f32 %v746_v29, %v800_v0  ;;  %v806_v3 = vpop.xlane.xlu1 %302 }
 0x126   :  { %v332_v8 = vsub.f32 %v750_v31, %v806_v3 }
 0x127   :  { %v604_v4 = vpop.eup %603  ;;  %v356_v5 = vmul.f32 1.442695, %v335_v1  ;;  %v348_v6 = vmul.f32 1.442695, %v331_v2 }
 0x128   :  { %v606_v7 = vpop.eup %605  ;;  %394 = vadd.xlane.f32.xlu0 %v604_v4  ;;  %v350_v9 = vmul.f32 1.442695, %v332_v8 }
 0x129   :  { %607 = vpow2.f32 %v356_v5  ;;  %402 = vadd.xlane.f32.xlu1 %v606_v7 }
 0x12a   :  { %609 = vpow2.f32 %v348_v6 }
 0x12b   :  { %611 = vpow2.f32 %v350_v9 }
 0x12c   :  { %v810_v10 = vpop.xlane.xlu0 %316 }
 0x12d   :  { %v339_v11 = vsub.f32 %v757_v35, %v810_v10  ;;  %v814_v12 = vpop.xlane.xlu1 %318 }
 0x12e   :  { %v340_v13 = vsub.f32 %v755_v34, %v814_v12 }
 0x12f   :  { %v608_v14 = vpop.eup %607  ;;  %v364_v15 = vmul.f32 1.442695, %v339_v11 }
 0x130   :  { %v610_v16 = vpop.eup %609  ;;  %v366_v17 = vmul.f32 1.442695, %v340_v13  ;;  %388 = vadd.xlane.f32.xlu0 %v608_v14 }
 0x131   :  { %613 = vpow2.f32 %v364_v15  ;;  %380 = vadd.xlane.f32.xlu2 %v610_v16  ;;  %v612_v27 = vpop.eup %611 }
 0x132   :  { %615 = vpow2.f32 %v366_v17 }
 0x133   :  { %v818_v18 = vpop.xlane.xlu2 %320 }
 0x134   :  { %v341_v21 = vsub.f32 %v763_v41, %v818_v18  ;;  %v822_v22 = vpop.xlane.xlu0 %310 }
 0x135   :  { %v336_v25 = vsub.f32 %v761_v39, %v822_v22  ;;  %v826_v26 = vpop.xlane.xlu1 %304 }
 0x136   :  { %v368_v28 = vmul.f32 1.442695, %v341_v21  ;;  %v333_v37 = vsub.f32 %v765_v42, %v826_v26 }
 0x137   :  { %v614_v32 = vpop.eup %613  ;;  %v358_v33 = vmul.f32 1.442695, %v336_v25 }
 0x138   :  { %v616_v36 = vpop.eup %615  ;;  %617 = vpow2.f32 %v368_v28  ;;  %382 = vadd.xlane.f32.xlu0 %v612_v27  ;;  %396 = vadd.xlane.f32.xlu1 %v614_v32  ;;  %v352_v40 = vmul.f32 1.442695, %v333_v37 }
 0x139   :  { %619 = vpow2.f32 %v358_v33  ;;  %398 = vadd.xlane.f32.xlu2 %v616_v36 }
 0x13a   :  { %621 = vpow2.f32 %v352_v40 }
 0x13b   :  { %v830_v38 = vpop.xlane.xlu2 %326 }
 0x13c   :  { %v344_v43 = vsub.f32 %v770_v44, %v830_v38  ;;  %v836_v53 = vpop.xlane.xlu0 %328 }
 0x13d   :  { %v834_v45 = vpop.xlane.xlu1 %312  ;;  %v345_v59 = vsub.f32 %v772_v46, %v836_v53 }
 0x13e   :  { %v618_v51 = vpop.eup %617  ;;  %v374_v52 = vmul.f32 1.442695, %v344_v43  ;;  %v337_v54 = vsub.f32 %v774_v47, %v834_v45 }
 0x13f   :  { %v620_v57 = vpop.eup %619  ;;  %v376_v60 = vmul.f32 1.442695, %v345_v59 }
 0x140   :  { %v360_v58 = vmul.f32 1.442695, %v337_v54  ;;  %400 = vadd.xlane.f32.xlu0 %v618_v51  ;;  %390 = vadd.xlane.f32.xlu1 %v620_v57  ;;  %623 = vpow2.f32 %v374_v52  ;;  %v622_v62 = vpop.eup %621 }
 0x142   :  { %625 = vpow2.f32 %v360_v58 }
 0x143   :  { %627 = vpow2.f32 %v376_v60 }
 0x145   :  { %v842_v61 = vpop.xlane.xlu1 %324 }
 0x146   :  { %v343_v1 = vsub.f32 %v779_v48, %v842_v61  ;;  %v624_v2 = vpop.eup %623 }
 0x148   :  { %v626_v4 = vpop.eup %625  ;;  %v372_v5 = vmul.f32 1.442695, %v343_v1  ;;  %406 = vadd.xlane.f32.xlu0 %v624_v2  ;;  %384 = vadd.xlane.f32.xlu1 %v622_v62 }
 0x149   :  { %392 = vadd.xlane.f32.xlu2 %v626_v4  ;;  %v628_v6 = vpop.eup %627 }
 0x14a   :  { %629 = vpow2.f32 %v372_v5 }
 0x150   :  { %v630_v7 = vpop.eup %629  ;;  %408 = vadd.xlane.f32.xlu1 %v628_v6 }
 0x151   :  { %404 = vadd.xlane.f32.xlu2 %v630_v7 }
 0x193   :  { %v387_v8 = vpop.xlane.xlu2 %386 }
 0x194   :  { %631 = vlog2.f32 %v387_v8  ;;  %v379_v9 = vpop.xlane.xlu1 %378 }
 0x195   :  { %633 = vlog2.f32 %v379_v9 }
 0x19a   :  { %v632_v11 = vpop.eup %631 }
 0x19b   :  { %v634_v13 = vpop.eup %633  ;;  %v419_v14 = vmul.f32 0.6931472, %v632_v11  ;;  %v395_v15 = vpop.xlane.xlu0 %394 }
 0x19c   :  { %v411_v16 = vmul.f32 0.6931472, %v634_v13  ;;  %635 = vlog2.f32 %v395_v15  ;;  %v403_v17 = vpop.xlane.xlu1 %402 }
 0x19d   :  { %v446_v21 = vadd.f32 %v419_v14, %v782_v49  ;;  %637 = vlog2.f32 %v403_v17 }
 0x19e   :  { %v442_v25 = vadd.f32 %v411_v16, %v784_v50 }
 0x19f   :  { %v462_v27 = vsub.f32 %v736_v20, %v446_v21 }
 0x1a0   :  { %v458_v28 = vsub.f32 %v734_v19, %v442_v25 }
 0x1a1   :  { %478 = vst [vmem:[%s929_s3 + $0x20] sm:$0xff] %v462_v27 }
 0x1a2   :  { %v636_v32 = vpop.eup %635  ;;  %474 = vst [vmem:[%s929_s3] sm:$0xff] %v458_v28 }
 0x1a3   :  { %v638_v33 = vpop.eup %637  ;;  %v427_v36 = vmul.f32 0.6931472, %v636_v32  ;;  %v389_v37 = vpop.xlane.xlu0 %388 }
 0x1a4   :  { %v435_v49 = vmul.f32 0.6931472, %v638_v33  ;;  %v381_v40 = vpop.xlane.xlu2 %380  ;;  %639 = vlog2.f32 %v389_v37 }
 0x1a5   :  { %v450_v50 = vadd.f32 %v427_v36, %v790_v55  ;;  %641 = vlog2.f32 %v381_v40 }
 0x1a6   :  { %v454_v19 = vadd.f32 %v435_v49, %v792_v56 }
 0x1a7   :  { %v466_v20 = vsub.f32 %v740_v23, %v450_v50 }
 0x1a8   :  { %v470_v43 = vsub.f32 %v742_v24, %v454_v19 }
 0x1a9   :  { %482 = vst [vmem:[%s929_s3 + $0x40] sm:$0xff] %v466_v20 }
 0x1aa   :  { %v640_v51 = vpop.eup %639  ;;  %486 = vst [vmem:[%s929_s3 + $0x60] sm:$0xff] %v470_v43 }
 0x1ab   :  { %v642_v52 = vpop.eup %641  ;;  %v421_v54 = vmul.f32 0.6931472, %v640_v51  ;;  %v383_v57 = vpop.xlane.xlu0 %382 }
 0x1ac   :  { %v397_v55 = vpop.xlane.xlu1 %396  ;;  %v413_v58 = vmul.f32 0.6931472, %v642_v52  ;;  %643 = vlog2.f32 %v383_v57  ;;  %v399_v56 = vpop.xlane.xlu2 %398 }
 0x1ad   :  { %v447_v23 = vadd.f32 %v421_v54, %v798_v63  ;;  %645 = vlog2.f32 %v399_v56 }
 0x1ae   :  { %v443_v24 = vadd.f32 %v413_v58, %v800_v0  ;;  %647 = vlog2.f32 %v397_v55 }
 0x1af   :  { %v463_v59 = vsub.f32 %v748_v30, %v447_v23 }
 0x1b0   :  { %v459_v60 = vsub.f32 %v746_v29, %v443_v24 }
 0x1b1   :  { %479 = vst [vmem:[%s929_s3 + $0x28] sm:$0xff] %v463_v59 }
 0x1b2   :  { %v644_v62 = vpop.eup %643  ;;  %475 = vst [vmem:[%s929_s3 + $0x8] sm:$0xff] %v459_v60 }
 0x1b3   :  { %v646_v1 = vpop.eup %645  ;;  %v415_v2 = vmul.f32 0.6931472, %v644_v62  ;;  %v401_v63 = vpop.xlane.xlu0 %400 }
 0x1b4   :  { %v391_v4 = vpop.xlane.xlu1 %390  ;;  %v648_v5 = vpop.eup %647  ;;  %v431_v0 = vmul.f32 0.6931472, %v646_v1  ;;  %649 = vlog2.f32 %v401_v63 }
 0x1b5   :  { %v444_v30 = vadd.f32 %v415_v2, %v806_v3  ;;  %v429_v6 = vmul.f32 0.6931472, %v648_v5  ;;  %651 = vlog2.f32 %v391_v4 }
 0x1b6   :  { %v452_v29 = vadd.f32 %v431_v0, %v814_v12 }
 0x1b7   :  { %v460_v7 = vsub.f32 %v750_v31, %v444_v30  ;;  %v451_v8 = vadd.f32 %v429_v6, %v810_v10 }
 0x1b8   :  { %v468_v9 = vsub.f32 %v755_v34, %v452_v29 }
 0x1b9   :  { %476 = vst [vmem:[%s929_s3 + $0x10] sm:$0xff] %v460_v7  ;;  %v467_v11 = vsub.f32 %v757_v35, %v451_v8 }
 0x1ba   :  { %v650_v13 = vpop.eup %649  ;;  %484 = vst [vmem:[%s929_s3 + $0x50] sm:$0xff] %v468_v9 }
 0x1bb   :  { %v652_v3 = vpop.eup %651  ;;  %483 = vst [vmem:[%s929_s3 + $0x48] sm:$0xff] %v467_v11  ;;  %v433_v31 = vmul.f32 0.6931472, %v650_v13  ;;  %v407_v10 = vpop.xlane.xlu0 %406 }
 0x1bc   :  { %v385_v12 = vpop.xlane.xlu1 %384  ;;  %v423_v34 = vmul.f32 0.6931472, %v652_v3  ;;  %653 = vlog2.f32 %v407_v10  ;;  %v393_v14 = vpop.xlane.xlu2 %392 }
 0x1bd   :  { %v453_v15 = vadd.f32 %v433_v31, %v818_v18  ;;  %655 = vlog2.f32 %v393_v14 }
 0x1be   :  { %v448_v35 = vadd.f32 %v423_v34, %v822_v22  ;;  %657 = vlog2.f32 %v385_v12 }
 0x1bf   :  { %v469_v16 = vsub.f32 %v763_v41, %v453_v15 }
 0x1c0   :  { %v464_v17 = vsub.f32 %v761_v39, %v448_v35 }
 0x1c1   :  { %485 = vst [vmem:[%s929_s3 + $0x58] sm:$0xff] %v469_v16 }
 0x1c2   :  { %v654_v21 = vpop.eup %653  ;;  %480 = vst [vmem:[%s929_s3 + $0x30] sm:$0xff] %v464_v17 }
 0x1c3   :  { %v656_v25 = vpop.eup %655  ;;  %v439_v27 = vmul.f32 0.6931472, %v654_v21 }
 0x1c4   :  { %v409_v18 = vpop.xlane.xlu1 %408  ;;  %v658_v28 = vpop.eup %657  ;;  %v425_v32 = vmul.f32 0.6931472, %v656_v25 }
 0x1c5   :  { %v405_v22 = vpop.xlane.xlu2 %404  ;;  %659 = vlog2.f32 %v409_v18  ;;  %v456_v41 = vadd.f32 %v439_v27, %v830_v38  ;;  %v417_v33 = vmul.f32 0.6931472, %v658_v28 }
 0x1c6   :  { %661 = vlog2.f32 %v405_v22  ;;  %v449_v39 = vadd.f32 %v425_v32, %v834_v45 }
 0x1c7   :  { %v472_v36 = vsub.f32 %v770_v44, %v456_v41  ;;  %v445_v37 = vadd.f32 %v417_v33, %v826_v26 }
 0x1c8   :  { %v465_v49 = vsub.f32 %v774_v47, %v449_v39 }
 0x1c9   :  { %488 = vst [vmem:[%s929_s3 + $0x70] sm:$0xff] %v472_v36  ;;  %v461_v40 = vsub.f32 %v765_v42, %v445_v37 }
 0x1ca   :  { %481 = vst [vmem:[%s929_s3 + $0x38] sm:$0xff] %v465_v49 }
 0x1cb   :  { %v660_v50 = vpop.eup %659  ;;  %477 = vst [vmem:[%s929_s3 + $0x18] sm:$0xff] %v461_v40 }
 0x1cc   :  { %v662_v38 = vpop.eup %661  ;;  %v441_v44 = vmul.f32 0.6931472, %v660_v50 }
 0x1cd   :  { %v437_v26 = vmul.f32 0.6931472, %v662_v38 }
 0x1ce   :  { %v457_v47 = vadd.f32 %v441_v44, %v836_v53 }
 0x1cf   :  { %v455_v45 = vadd.f32 %v437_v26, %v842_v61 }
 0x1d0   :  { %v473_v19 = vsub.f32 %v772_v46, %v457_v47 }
 0x1d1   :  { %v471_v42 = vsub.f32 %v779_v48, %v455_v45 }
 0x1d2   :  { %489 = vst [vmem:[%s929_s3 + $0x78] sm:$0xff] %v473_v19 }
 0x1d3   :  { %487 = vst [vmem:[%s929_s3 + $0x68] sm:$0xff] %v471_v42 }

</bundles_post_ra>
